<compile_context>
chip_gen: v7x
topology: tpu7x:2x2x1
jax: 0.10.0
libtpu: 0.0.40
codegen_flags: <defaults>
</compile_context>

<pallas_src>
import jax
import jax.numpy as jnp
from jax.experimental import pallas as pl
from jax.experimental.pallas import tpu as pltpu

EPS = 1e-5


def _device_kind():
    try:
        return jax.devices()[0].device_kind.lower()
    except Exception:
        return ""


def _min_batch_tiles():
    # v7x has 2 TensorCores per chip: ensure the ("parallel",) grid axis has
    # at least 2 steps so both cores get work. Single-TC chips keep max
    # lane packing (density is all that matters there).
    return 2 if "v7" in _device_kind() else 1


def _lane_target(packed_width):
    # v6e/v7x MXUs are 2x256x256: a 256-wide output tile halves MXU passes
    # when there is enough packed batch*length to fill it. Keep 128 on v5e.
    kind = _device_kind()
    if packed_width >= 256 and ("v6" in kind or "v7" in kind):
        return 256
    return 128


def _make_kernel(C, Cin, TB, Ltot, cg1, cg2, inv_n1, inv_n2):
    """Kernel factory: statics baked in, optional projector refs via *rest."""

    def kernel(xp_ref, w1_ref, w2_ref, consts_ref, selgb_ref, *rest):
        o_ref = rest[-1]
        proj = list(rest[:-1])
        p1_ref = proj.pop(0) if cg1 > 1 else None
        p2_ref = proj.pop(0) if cg2 > 1 else None

        xp = xp_ref[0]                                     # (C, Ltot)
        tb1 = consts_ref[0:Cin, :]                         # conv1 t-channel bias
        cb2 = consts_ref[Cin:Cin + C, :]                   # conv2 (t, beta1) bias
        selT = consts_ref[Cin + C:Cin + C + TB, :]         # (TB, Ltot)
        sel = selgb_ref[0:Ltot, :]                         # (Ltot, TB)
        g2b = selgb_ref[Ltot:Ltot + C, :]                  # gamma2 per segment
        bt2b = selgb_ref[Ltot + C:Ltot + 2 * C, :]         # beta2 per segment

        # ---- conv1: in-kernel 3-tap im2col (lane rolls, XLU slot) + 1 matmul.
        # Roll wrap-around only lands on invalid/pad columns (already zero),
        # so this exactly reproduces the 'same' zero padding at valid columns.
        x3 = jnp.concatenate(
            [pltpu.roll(xp, shift=1, axis=1), xp,
             pltpu.roll(xp, shift=Ltot - 1, axis=1)], axis=0)      # (3C, Ltot)
        y = jnp.dot(w1_ref[...], x3, preferred_element_type=jnp.float32)
        y = jnp.maximum(y + tb1, 0.0)                               # (Cin, Ltot)

        # ---- GroupNorm1: stacked [y; y*y] stats, one matmul each stage.
        st1 = jnp.dot(jnp.concatenate([y, y * y], axis=0), sel,
                      preferred_element_type=jnp.float32)           # (2Cin, TB)
        if cg1 == 1:
            st1 = st1 * inv_n1
        else:
            st1 = jnp.dot(p1_ref[...], st1, preferred_element_type=jnp.float32)
        mean1 = st1[0:Cin, :]
        inv1 = jax.lax.rsqrt(st1[Cin:, :] - mean1 * mean1 + EPS)
        mi1 = jnp.dot(jnp.concatenate([mean1, inv1], axis=0), selT,
                      preferred_element_type=jnp.float32)           # (2Cin, Ltot)
        # inv_std broadcast is 0 at pad/invalid columns -> z == 0 there, which
        # doubles as conv2's zero 'same' padding (gamma1/beta1 folded into w2).
        z = (y - mi1[0:Cin, :]) * mi1[Cin:, :]

        # ---- conv2: fused 3-tap single MXU matmul.
        z3 = jnp.concatenate(
            [pltpu.roll(z, shift=1, axis=1), z,
             pltpu.roll(z, shift=Ltot - 1, axis=1)], axis=0)        # (3Cin, Ltot)
        y2 = jnp.dot(w2_ref[...], z3, preferred_element_type=jnp.float32)
        y2 = jnp.maximum(y2 + cb2, 0.0)                              # (C, Ltot)

        # ---- GroupNorm2 with gamma2/beta2 folded into pre-broadcast a/b.
        st2 = jnp.dot(jnp.concatenate([y2, y2 * y2], axis=0), sel,
                      preferred_element_type=jnp.float32)            # (2C, TB)
        if cg2 == 1:
            st2 = st2 * inv_n2
        else:
            st2 = jnp.dot(p2_ref[...], st2, preferred_element_type=jnp.float32)
        mean2 = st2[0:C, :]
        inv2 = jax.lax.rsqrt(st2[C:, :] - mean2 * mean2 + EPS)
        a = inv2 * g2b                                                # (C, TB)
        b = bt2b - mean2 * a
        ab = jnp.dot(jnp.concatenate([a, b], axis=0), selT,
                     preferred_element_type=jnp.float32)              # (2C, Ltot)
        o_ref[0] = (y2 * ab[0:C, :] + ab[C:, :]).astype(o_ref.dtype)

    return kernel


def odefunc_forward(t, x, w1, w2, g1, b1, g2, b2, num_groups):
    """t: scalar; x: (B, C, L); w1: (Cin, C+1, 3); w2: (C, Cin+1, 3)."""
    B, C, L = x.shape
    Cin = w1.shape[0]
    cg1 = Cin // num_groups
    cg2 = C // num_groups
    f32 = jnp.float32

    x = x.astype(f32)
    w1 = w1.astype(f32)
    w2 = w2.astype(f32)
    g1 = g1.astype(f32)
    b1 = b1.astype(f32)
    g2 = g2.astype(f32)
    b2 = b2.astype(f32)
    t = jnp.asarray(t, f32)

    # --- packing geometry: TB padded batch segments per lane-dense tile ---
    Lseg = L + 2                                   # one zero-pad column each side
    lane = _lane_target(B * Lseg)
    TB = max(1, min(B, lane // Lseg)) if Lseg <= lane else 1
    min_tiles = _min_batch_tiles()
    if min_tiles > 1 and B >= min_tiles:
        TB = min(TB, pl.cdiv(B, min_tiles))        # v7x: keep both TCs busy
    NB = pl.cdiv(B, TB)                            # grid size (batch tiles)
    B_pad = NB * TB
    Lpack = TB * Lseg
    Ltot = pl.cdiv(Lpack, lane) * lane

    # --- pack x into (NB, C, Ltot); each segment zero-padded for the conv ---
    xb = jnp.pad(x, ((0, B_pad - B), (0, 0), (0, 0)))
    xp = jnp.pad(xb, ((0, 0), (0, 0), (1, 1)))                       # (B_pad, C, Lseg)
    xp = xp.reshape(NB, TB, C, Lseg).transpose(0, 2, 1, 3).reshape(NB, C, Lpack)
    xp = jnp.pad(xp, ((0, 0), (0, 0), (0, Ltot - Lpack)))            # (NB, C, Ltot)

    # --- valid-column machinery (constant across grid steps) ---
    col = jnp.arange(Ltot)
    seg_idx = jnp.minimum(col // Lseg, TB - 1)
    pos = col - seg_idx * Lseg
    valid = (col < Lpack) & (pos >= 1) & (pos <= L)
    validf = valid.astype(f32)
    sel = (valid[:, None] &
           (seg_idx[:, None] == jnp.arange(TB)[None, :])).astype(f32)  # (Ltot, TB)
    selT = jnp.transpose(sel)                                          # (TB, Ltot)
    vpad = jnp.pad(validf, (1, 1))
    sv = jnp.stack([vpad[0:Ltot], vpad[1:Ltot + 1], vpad[2:Ltot + 2]], axis=0)

    # --- conv1: stack taps along contraction axis; fold t channel into bias ---
    w1s = jnp.concatenate([w1[:, 1:, 0], w1[:, 1:, 1], w1[:, 1:, 2]], axis=1)
    tbias1 = t * jnp.dot(w1[:, 0, :], sv)                              # (Cin, Ltot)

    # --- conv2: fold gamma1 into weights, t/beta1 into bias, stack taps ---
    w2s = jnp.concatenate([w2[:, 1:, 0] * g1[None, :],
                           w2[:, 1:, 1] * g1[None, :],
                           w2[:, 1:, 2] * g1[None, :]], axis=1)        # (C, 3Cin)
    bk = jnp.dot(jnp.transpose(w2[:, 1:, :], (0, 2, 1)), b1) + t * w2[:, 0, :]
    cbias2 = jnp.dot(bk, sv)                                           # (C, Ltot)

    # --- coalesced constant operands (fewer DMAs / BlockSpecs) ---
    consts = jnp.concatenate([tbias1, cbias2, selT], axis=0)           # (Cin+C+TB, Ltot)
    selgb = jnp.concatenate([sel,
                             jnp.broadcast_to(g2[:, None], (C, TB)),
                             jnp.broadcast_to(b2[:, None], (C, TB))],
                            axis=0)                                    # (Ltot+2C, TB)

    # --- block-diagonal group projectors, pre-scaled by 1/(cg*L) ---
    def projector2(c, cg):
        gidx = jnp.arange(c) // cg
        P = (gidx[:, None] == gidx[None, :]).astype(f32) / float(cg * L)
        Z = jnp.zeros_like(P)
        return jnp.concatenate(
            [jnp.concatenate([P, Z], axis=1),
             jnp.concatenate([Z, P], axis=1)], axis=0)                 # (2c, 2c)

    operands = [xp, w1s, w2s, consts, selgb]
    in_specs = [
        pl.BlockSpec((1, C, Ltot), lambda n: (n, 0, 0)),   # raw input tile per batch tile
        pl.BlockSpec(w1s.shape, lambda n: (0, 0)),         # conv1 stacked weights
        pl.BlockSpec(w2s.shape, lambda n: (0, 0)),         # conv2 stacked weights
        pl.BlockSpec(consts.shape, lambda n: (0, 0)),      # tbias1 | cbias2 | selT
        pl.BlockSpec(selgb.shape, lambda n: (0, 0)),       # sel | gamma2 | beta2
    ]
    if cg1 > 1:
        P1_2 = projector2(Cin, cg1)
        operands.append(P1_2)
        in_specs.append(pl.BlockSpec(P1_2.shape, lambda n: (0, 0)))
    if cg2 > 1:
        P2_2 = projector2(C, cg2)
        operands.append(P2_2)
        in_specs.append(pl.BlockSpec(P2_2.shape, lambda n: (0, 0)))

    kernel = _make_kernel(C, Cin, TB, Ltot, cg1, cg2,
                          1.0 / float(cg1 * L), 1.0 / float(cg2 * L))

    out_packed = pl.pallas_call(
        kernel,
        out_shape=jax.ShapeDtypeStruct((NB, C, Ltot), f32),
        grid=(NB,),
        in_specs=in_specs,
        out_specs=pl.BlockSpec((1, C, Ltot), lambda n: (n, 0, 0)),
        compiler_params=pltpu.CompilerParams(
            dimension_semantics=("parallel",)),            # batch tiles shard across TCs
    )(*operands)

    # --- unpack: drop per-segment pads, lane padding, and padded batches ---
    out = out_packed[:, :, :Lpack].reshape(NB, C, TB, Lseg)
    out = out.transpose(0, 2, 1, 3).reshape(B_pad, C, Lseg)[:B, :, 1:L + 1]
    return out


def odefunc_reference(t, x, w1, w2, g1, b1, g2, b2, num_groups):
    """Plain-JAX reference matching PyTorch semantics (for verification)."""
    def concat_conv(t, x, w):
        B, C, L = x.shape
        tt = jnp.full((B, 1, L), t, x.dtype)
        xt = jnp.concatenate([tt, x], axis=1)
        return jax.lax.conv_general_dilated(
            xt, w, window_strides=(1,), padding="SAME",
            dimension_numbers=("NCH", "OIH", "NCH"))

    def gn(y, gamma, beta):
        B, C, L = y.shape
        yg = y.reshape(B, num_groups, (C // num_groups) * L)
        mu = yg.mean(-1, keepdims=True)
        var = yg.var(-1, keepdims=True)   # biased
        yn = ((yg - mu) / jnp.sqrt(var + EPS)).reshape(B, C, L)
        return yn * gamma[None, :, None] + beta[None, :, None]

    y = jax.nn.relu(concat_conv(t, x, w1))
    y = gn(y, g1, b1)
    y = jax.nn.relu(concat_conv(t, y, w2))
    y = gn(y, g2, b2)
    return y


if __name__ == "__main__":
    # shapes consistent with ODEfunc(n_channels=8, n_inner_channels=16, num_groups=8)
    B, C, C_inner, L, G = 2, 8, 16, 16, 8
    K = 3

    key = jax.random.PRNGKey(0)
    kx, kw1, kw2, kg1, kb1, kg2, kb2 = jax.random.split(key, 7)

    x = jax.random.normal(kx, (B, C, L), dtype=jnp.float32)
    t = jnp.float32(0.37)

    # conv1: Conv1d(C+1 -> C_inner, k=3, padding='same', bias=False)
    w1 = jax.random.normal(kw1, (C_inner, C + 1, K), dtype=jnp.float32) * 0.2
    # conv2: Conv1d(C_inner+1 -> C, k=3, padding='same', bias=False)
    w2 = jax.random.normal(kw2, (C, C_inner + 1, K), dtype=jnp.float32) * 0.2
    # GroupNorm affine params
    g1 = 1.0 + 0.1 * jax.random.normal(kg1, (C_inner,), dtype=jnp.float32)
    b1 = 0.1 * jax.random.normal(kb1, (C_inner,), dtype=jnp.float32)
    g2 = 1.0 + 0.1 * jax.random.normal(kg2, (C,), dtype=jnp.float32)
    b2 = 0.1 * jax.random.normal(kb2, (C,), dtype=jnp.float32)

    out = odefunc_forward(t, x, w1, w2, g1, b1, g2, b2, G)
    out = jax.block_until_ready(out)

    ref = odefunc_reference(t, x, w1, w2, g1, b1, g2, b2, G)
    assert out.shape == (B, C, L)
    assert jnp.allclose(out, ref, rtol=1e-4, atol=1e-4), (
        f"max abs err {jnp.max(jnp.abs(out - ref))}")

    print("KERNEL_OK")
</pallas_src>

<mosaic_0001>
module attributes {stable_mosaic.version = 11 : i64} {
  func.func @kernel(%arg0: i32, %arg1: memref<1x8x128xf32, #tpu.memory_space<vmem>>, %arg2: memref<16x24xf32, #tpu.memory_space<vmem>>, %arg3: memref<8x48xf32, #tpu.memory_space<vmem>>, %arg4: memref<26x128xf32, #tpu.memory_space<vmem>>, %arg5: memref<144x2xf32, #tpu.memory_space<vmem>>, %arg6: memref<32x32xf32, #tpu.memory_space<vmem>>, %arg7: memref<1x8x128xf32, #tpu.memory_space<vmem>>) attributes {dimension_semantics = [#tpu.dimension_semantics<parallel>], iteration_bounds = array<i64: 1>, scalar_prefetch = 0 : i64, scratch_operands = 0 : i64, tpu.core_type = #tpu.core_type<tc>, window_params = [{transform_indices = @transform_0, window_bounds = array<i64: 1, 8, 128>}, {pipeline_mode = #tpu.pipeline_mode<synchronous>, transform_indices = @transform_1, window_bounds = array<i64: 16, 24>}, {pipeline_mode = #tpu.pipeline_mode<synchronous>, transform_indices = @transform_2, window_bounds = array<i64: 8, 48>}, {pipeline_mode = #tpu.pipeline_mode<synchronous>, transform_indices = @transform_3, window_bounds = array<i64: 26, 128>}, {pipeline_mode = #tpu.pipeline_mode<synchronous>, transform_indices = @transform_4, window_bounds = array<i64: 144, 2>}, {pipeline_mode = #tpu.pipeline_mode<synchronous>, transform_indices = @transform_5, window_bounds = array<i64: 32, 32>}, {transform_indices = @transform_6, window_bounds = array<i64: 1, 8, 128>}]} {
    %c0 = arith.constant 0 : index
    %c0_0 = arith.constant 0 : index
    %c0_1 = arith.constant 0 : index
    %0 = vector.load %arg1[%c0, %c0_0, %c0_1] : memref<1x8x128xf32, #tpu.memory_space<vmem>>, vector<1x8x128xf32>
    %1 = vector.shape_cast %0 : vector<1x8x128xf32> to vector<8x128xf32>
    %c0_2 = arith.constant 0 : index
    %c0_3 = arith.constant 0 : index
    %2 = vector.load %arg4[%c0_2, %c0_3] : memref<26x128xf32, #tpu.memory_space<vmem>>, vector<16x128xf32>
    %c16 = arith.constant 16 : index
    %c0_4 = arith.constant 0 : index
    %3 = vector.load %arg4[%c16, %c0_4] : memref<26x128xf32, #tpu.memory_space<vmem>>, vector<8x128xf32>
    %c24 = arith.constant 24 : index
    %c0_5 = arith.constant 0 : index
    %4 = vector.load %arg4[%c24, %c0_5] : memref<26x128xf32, #tpu.memory_space<vmem>>, vector<2x128xf32>
    %c0_6 = arith.constant 0 : index
    %c0_7 = arith.constant 0 : index
    %5 = vector.load %arg5[%c0_6, %c0_7] : memref<144x2xf32, #tpu.memory_space<vmem>>, vector<128x2xf32>
    %c128 = arith.constant 128 : index
    %c0_8 = arith.constant 0 : index
    %6 = vector.load %arg5[%c128, %c0_8] : memref<144x2xf32, #tpu.memory_space<vmem>>, vector<8x2xf32>
    %c136 = arith.constant 136 : index
    %c0_9 = arith.constant 0 : index
    %7 = vector.load %arg5[%c136, %c0_9] : memref<144x2xf32, #tpu.memory_space<vmem>>, vector<8x2xf32>
    %c1_i32 = arith.constant 1 : i32
    %8 = tpu.dynamic_rotate %1 by %c1_i32 dim 1 : vector<8x128xf32>, i32 -> vector<8x128xf32>
    %c127_i32 = arith.constant 127 : i32
    %9 = tpu.dynamic_rotate %1 by %c127_i32 dim 1 : vector<8x128xf32>, i32 -> vector<8x128xf32>
    %10 = tpu.concatenate %8, %1, %9 in 0 : vector<8x128xf32>, vector<8x128xf32>, vector<8x128xf32> -> vector<24x128xf32>
    %c0_10 = arith.constant 0 : index
    %c0_11 = arith.constant 0 : index
    %11 = vector.load %arg2[%c0_10, %c0_11] : memref<16x24xf32, #tpu.memory_space<vmem>>, vector<16x24xf32>
    %cst = arith.constant dense<0.000000e+00> : vector<16x128xf32>
    %12 = tpu.matmul %11, %10, %cst {dimension_numbers = #tpu.dot_dimension_numbers<[1], [0], [0], [1], [0, 0, 1, 1], [], []>} : vector<16x24xf32>, vector<24x128xf32>, vector<16x128xf32> -> vector<16x128xf32>
    %13 = arith.addf %12, %2 : vector<16x128xf32>
    %cst_12 = arith.constant 0.000000e+00 : f32
    %14 = vector.broadcast %cst_12 : f32 to vector<16x128xf32>
    %15 = arith.maximumf %13, %14 : vector<16x128xf32>
    %16 = arith.mulf %15, %15 : vector<16x128xf32>
    %17 = tpu.concatenate %15, %16 in 0 : vector<16x128xf32>, vector<16x128xf32> -> vector<32x128xf32>
    %cst_13 = arith.constant dense<0.000000e+00> : vector<32x2xf32>
    %18 = tpu.matmul %17, %5, %cst_13 {dimension_numbers = #tpu.dot_dimension_numbers<[1], [0], [0], [1], [0, 0, 1, 1], [], []>} : vector<32x128xf32>, vector<128x2xf32>, vector<32x2xf32> -> vector<32x2xf32>
    %c0_14 = arith.constant 0 : index
    %c0_15 = arith.constant 0 : index
    %19 = vector.load %arg6[%c0_14, %c0_15] : memref<32x32xf32, #tpu.memory_space<vmem>>, vector<32x32xf32>
    %cst_16 = arith.constant dense<0.000000e+00> : vector<32x2xf32>
    %20 = tpu.matmul %19, %18, %cst_16 {dimension_numbers = #tpu.dot_dimension_numbers<[1], [0], [0], [1], [0, 0, 1, 1], [], []>} : vector<32x32xf32>, vector<32x2xf32>, vector<32x2xf32> -> vector<32x2xf32>
    %21 = vector.extract_strided_slice %20 {offsets = [0, 0], sizes = [16, 2], strides = [1, 1]} : vector<32x2xf32> to vector<16x2xf32>
    %22 = vector.extract_strided_slice %20 {offsets = [16, 0], sizes = [16, 2], strides = [1, 1]} : vector<32x2xf32> to vector<16x2xf32>
    %23 = arith.mulf %21, %21 : vector<16x2xf32>
    %24 = arith.subf %22, %23 : vector<16x2xf32>
    %cst_17 = arith.constant 9.99999974E-6 : f32
    %25 = vector.broadcast %cst_17 : f32 to vector<16x2xf32>
    %26 = arith.addf %24, %25 : vector<16x2xf32>
    %27 = math.rsqrt %26 : vector<16x2xf32>
    %28 = tpu.concatenate %21, %27 in 0 : vector<16x2xf32>, vector<16x2xf32> -> vector<32x2xf32>
    %cst_18 = arith.constant dense<0.000000e+00> : vector<32x128xf32>
    %29 = tpu.matmul %28, %4, %cst_18 {dimension_numbers = #tpu.dot_dimension_numbers<[1], [0], [0], [1], [0, 0, 1, 1], [], []>} : vector<32x2xf32>, vector<2x128xf32>, vector<32x128xf32> -> vector<32x128xf32>
    %30 = vector.extract_strided_slice %29 {offsets = [0, 0], sizes = [16, 128], strides = [1, 1]} : vector<32x128xf32> to vector<16x128xf32>
    %31 = arith.subf %15, %30 : vector<16x128xf32>
    %32 = vector.extract_strided_slice %29 {offsets = [16, 0], sizes = [16, 128], strides = [1, 1]} : vector<32x128xf32> to vector<16x128xf32>
    %33 = arith.mulf %31, %32 : vector<16x128xf32>
    %c1_i32_19 = arith.constant 1 : i32
    %34 = tpu.dynamic_rotate %33 by %c1_i32_19 dim 1 : vector<16x128xf32>, i32 -> vector<16x128xf32>
    %c127_i32_20 = arith.constant 127 : i32
    %35 = tpu.dynamic_rotate %33 by %c127_i32_20 dim 1 : vector<16x128xf32>, i32 -> vector<16x128xf32>
    %36 = tpu.concatenate %34, %33, %35 in 0 : vector<16x128xf32>, vector<16x128xf32>, vector<16x128xf32> -> vector<48x128xf32>
    %c0_21 = arith.constant 0 : index
    %c0_22 = arith.constant 0 : index
    %37 = vector.load %arg3[%c0_21, %c0_22] : memref<8x48xf32, #tpu.memory_space<vmem>>, vector<8x48xf32>
    %cst_23 = arith.constant dense<0.000000e+00> : vector<8x128xf32>
    %38 = tpu.matmul %37, %36, %cst_23 {dimension_numbers = #tpu.dot_dimension_numbers<[1], [0], [0], [1], [0, 0, 1, 1], [], []>} : vector<8x48xf32>, vector<48x128xf32>, vector<8x128xf32> -> vector<8x128xf32>
    %39 = arith.addf %38, %3 : vector<8x128xf32>
    %cst_24 = arith.constant 0.000000e+00 : f32
    %40 = vector.broadcast %cst_24 : f32 to vector<8x128xf32>
    %41 = arith.maximumf %39, %40 : vector<8x128xf32>
    %42 = arith.mulf %41, %41 : vector<8x128xf32>
    %43 = tpu.concatenate %41, %42 in 0 : vector<8x128xf32>, vector<8x128xf32> -> vector<16x128xf32>
    %cst_25 = arith.constant dense<0.000000e+00> : vector<16x2xf32>
    %44 = tpu.matmul %43, %5, %cst_25 {dimension_numbers = #tpu.dot_dimension_numbers<[1], [0], [0], [1], [0, 0, 1, 1], [], []>} : vector<16x128xf32>, vector<128x2xf32>, vector<16x2xf32> -> vector<16x2xf32>
    %cst_26 = arith.constant 6.250000e-02 : f32
    %45 = vector.broadcast %cst_26 : f32 to vector<16x2xf32>
    %46 = arith.mulf %44, %45 : vector<16x2xf32>
    %47 = vector.extract_strided_slice %46 {offsets = [0, 0], sizes = [8, 2], strides = [1, 1]} : vector<16x2xf32> to vector<8x2xf32>
    %48 = vector.extract_strided_slice %46 {offsets = [8, 0], sizes = [8, 2], strides = [1, 1]} : vector<16x2xf32> to vector<8x2xf32>
    %49 = arith.mulf %47, %47 : vector<8x2xf32>
    %50 = arith.subf %48, %49 : vector<8x2xf32>
    %cst_27 = arith.constant 9.99999974E-6 : f32
    %51 = vector.broadcast %cst_27 : f32 to vector<8x2xf32>
    %52 = arith.addf %50, %51 : vector<8x2xf32>
    %53 = math.rsqrt %52 : vector<8x2xf32>
    %54 = arith.mulf %53, %6 : vector<8x2xf32>
    %55 = arith.mulf %47, %54 : vector<8x2xf32>
    %56 = arith.subf %7, %55 : vector<8x2xf32>
    %57 = tpu.concatenate %54, %56 in 0 : vector<8x2xf32>, vector<8x2xf32> -> vector<16x2xf32>
    %cst_28 = arith.constant dense<0.000000e+00> : vector<16x128xf32>
    %58 = tpu.matmul %57, %4, %cst_28 {dimension_numbers = #tpu.dot_dimension_numbers<[1], [0], [0], [1], [0, 0, 1, 1], [], []>} : vector<16x2xf32>, vector<2x128xf32>, vector<16x128xf32> -> vector<16x128xf32>
    %59 = vector.extract_strided_slice %58 {offsets = [0, 0], sizes = [8, 128], strides = [1, 1]} : vector<16x128xf32> to vector<8x128xf32>
    %60 = arith.mulf %41, %59 : vector<8x128xf32>
    %61 = vector.extract_strided_slice %58 {offsets = [8, 0], sizes = [8, 128], strides = [1, 1]} : vector<16x128xf32> to vector<8x128xf32>
    %62 = arith.addf %60, %61 : vector<8x128xf32>
    %c0_29 = arith.constant 0 : index
    %c0_30 = arith.constant 0 : index
    %c0_31 = arith.constant 0 : index
    %63 = vector.load %arg7[%c0_29, %c0_30, %c0_31] : memref<1x8x128xf32, #tpu.memory_space<vmem>>, vector<1x8x128xf32>
    %64 = vector.shape_cast %63 : vector<1x8x128xf32> to vector<8x128xf32>
    %65 = vector.shape_cast %62 : vector<8x128xf32> to vector<1x8x128xf32>
    tpu.vector_store %arg7[%c0_29, %c0_30, %c0_31], %65 {strides = array<i32>} : memref<1x8x128xf32, #tpu.memory_space<vmem>>, vector<1x8x128xf32>,
    return
  }
  func.func @transform_0(%arg0: i32) -> (i32, i32, i32) {
    %c0_i32 = arith.constant 0 : i32
    %c0_i32_0 = arith.constant 0 : i32
    %c0_i32_1 = arith.constant 0 : i32
    return %arg0, %c0_i32, %c0_i32_0 : i32, i32, i32
  }
  func.func @transform_1(%arg0: i32) -> (i32, i32) {
    %c0_i32 = arith.constant 0 : i32
    %c0_i32_0 = arith.constant 0 : i32
    %c0_i32_1 = arith.constant 0 : i32
    return %c0_i32, %c0_i32_0 : i32, i32
  }
  func.func @transform_2(%arg0: i32) -> (i32, i32) {
    %c0_i32 = arith.constant 0 : i32
    %c0_i32_0 = arith.constant 0 : i32
    %c0_i32_1 = arith.constant 0 : i32
    return %c0_i32, %c0_i32_0 : i32, i32
  }
  func.func @transform_3(%arg0: i32) -> (i32, i32) {
    %c0_i32 = arith.constant 0 : i32
    %c0_i32_0 = arith.constant 0 : i32
    %c0_i32_1 = arith.constant 0 : i32
    return %c0_i32, %c0_i32_0 : i32, i32
  }
  func.func @transform_4(%arg0: i32) -> (i32, i32) {
    %c0_i32 = arith.constant 0 : i32
    %c0_i32_0 = arith.constant 0 : i32
    %c0_i32_1 = arith.constant 0 : i32
    return %c0_i32, %c0_i32_0 : i32, i32
  }
  func.func @transform_5(%arg0: i32) -> (i32, i32) {
    %c0_i32 = arith.constant 0 : i32
    %c0_i32_0 = arith.constant 0 : i32
    %c0_i32_1 = arith.constant 0 : i32
    return %c0_i32, %c0_i32_0 : i32, i32
  }
  func.func @transform_6(%arg0: i32) -> (i32, i32, i32) {
    %c0_i32 = arith.constant 0 : i32
    %c0_i32_0 = arith.constant 0 : i32
    %c0_i32_1 = arith.constant 0 : i32
    return %arg0, %c0_i32, %c0_i32_0 : i32, i32, i32
  }
}

</mosaic_0001>

<bundles_post_ra>
// kernel: tpu_custom_call.1
= control target key start
LH: loop header
LB: loop body
LE: loop exit
PB: predicated region body
PF: predicated region fallthrough
CT: control target
= control target key end

     0   :  { %vm53_vm0 = vcmask 195584   ;;  %s1043_s25 = smov 1   ;;  %s1044_s13 = smov 127   ;;  %s1224_s0 = inlined_call_operand.vmem [shape: f32[1,8,128], index: 0, kind: input, shape index: {}]   ;;  %s1225_s1 = inlined_call_operand.vmem [shape: f32[16,24], index: 1, kind: input, shape index: {}]   ;;  %s1226_s2 = inlined_call_operand.vmem [shape: f32[8,48], index: 2, kind: input, shape index: {}]   ;;  %s1227_s3 = inlined_call_operand.vmem [shape: f32[26,128], index: 3, kind: input, shape index: {}]   ;;  %s1228_s4 = inlined_call_operand.vmem [shape: f32[144,2], index: 4, kind: input, shape index: {}]   ;;  %s1229_s5 = inlined_call_operand.vmem [shape: f32[32,32], index: 5, kind: input, shape index: {}]   ;;  %s1230_s6 = inlined_call_operand.hbm [shape: f32[1,8,128], index: 6, kind: output, shape index: {}]  }
   0x1   :  { %v24_v0 = vld [vmem:[%s1224_s0] sm:$0xff]  ;;  %v30_v3 = vld [vmem:[%s1228_s4 + $0x8] sm:$0xff]  ;;  %v31_v4 = vld [vmem:[%s1228_s4 + $0x10] sm:$0xff] }
   0x2   :  { %v51_v1 = vld [vmem:[%s1225_s1] sm:$0xff]  ;;  %47 = vrot.lane.b32.xlu0 %v24_v0, %s1043_s25  ;;  %v32_v6 = vld [vmem:[%s1228_s4 + $0x18] sm:$0xff]  ;;  %v34_v9 = vld [vmem:[%s1228_s4 + $0x28] sm:$0xff] }
   0x3   :  { %794 = vmatprep.mubr.msk.f32.mxu0 %vm53_vm0, %v51_v1  ;;  %v29_v2 = vld [vmem:[%s1228_s4] sm:$0xff]  ;;  %v1104_v7 = vpack.c.bf16 %v32_v6, %v31_v4 }
   0x4   :  { %v916_v5 = vpack.c.bf16 %v30_v3, %v29_v2  ;;  %v33_v8 = vld [vmem:[%s1228_s4 + $0x20] sm:$0xff] }
   0x5   :  { %v924_v10 = vpack.c.bf16 %v34_v9, %v33_v8 }
   0x6   :  { %917 = vmatprep.subr.bf16.mxu1 %v916_v5  ;;  %49 = vrot.lane.b32.xlu0 %v24_v0, %s1044_s13 }
   0x7   :  { %919 = vmatpush3.bf16.msra.mxu1 %v916_v5 }
   0x8   :  { %921 = vmatprep.subr.bf16.mxu1 %v1104_v7 }
   0x9   :  { %11 = vsyncpa [#allocation3], 0  ;;  %v35_v11 = vld [vmem:[%s1228_s4 + $0x30] sm:$0xff]  ;;  %v36_v12 = vld [vmem:[%s1228_s4 + $0x38] sm:$0xff]  ;;  %vm228_vm1 = vcmask 261120   ;;  %vm347_vm2 = vcmask 1041408  }
   0xa   :  { %v928_v13 = vpack.c.bf16 %v36_v12, %v35_v11  ;;  %v37_v14 = vld [vmem:[%s1228_s4 + $0x40] sm:$0xff]  ;;  %v38_v15 = vld [vmem:[%s1228_s4 + $0x48] sm:$0xff]  ;;  %v39_v17 = vld [vmem:[%s1228_s4 + $0x50] sm:$0xff]  ;;  %vm334_vm3 = vcmask 15360   ;;  %v1045_v1 = vmov 0.0|0.0   ;;  %vm1046_vm4 = vmmov 0  }
   0xb   :  { %923 = vmatpush3.bf16.msra.mxu1 %v1104_v7  ;;  %v932_v16 = vpack.c.bf16 %v38_v15, %v37_v14  ;;  %v40_v18 = vld [vmem:[%s1228_s4 + $0x58] sm:$0xff]  ;;  %v41_v20 = vld [vmem:[%s1228_s4 + $0x60] sm:$0xff]  ;;  %v42_v21 = vld [vmem:[%s1228_s4 + $0x68] sm:$0xff]  ;;  %vm449_vm5 = vcmask 392192   ;;  %s1048_s30 = smov [#allocation2]  }
   0xc   :  { %925 = vmatprep.subr.bf16.mxu1 %v924_v10  ;;  %v936_v19 = vpack.c.bf16 %v40_v18, %v39_v17  ;;  %v940_v22 = vpack.c.bf16 %v42_v21, %v41_v20  ;;  %v52_v26 = vld [vmem:[%s1225_s1 + $0x8] sm:$0xff]  ;;  %v43_v27 = vld [vmem:[%s1228_s4 + $0x70] sm:$0xff]  ;;  %v44_v28 = vld [vmem:[%s1228_s4 + $0x78] sm:$0xff]  ;;  %s699_s0 = sshll.u32 %s1048_s30, 4  ;;  %s700_s0 = int_to_ptr.vmem [resolvable:$true] %s699_s0 }
   0xd   :  { %v944_v29 = vpack.c.bf16 %v44_v28, %v43_v27  ;;  %v26_v30 = vld [vmem:[%s1227_s3 + $0x8] sm:$0xff]  ;;  %v25_v31 = vld [vmem:[%s1227_s3] sm:$0xff]  ;;  %v226_v48 = vld [vmem:[%s1229_s5 + $0x10] sm:$0xff]  ;;  %s1019_s7 = scalar_lea.vmem %s700_s0, 128  ;;  %p1024_p1 = scmp.lt.s32.totalorder %s700_s0, %s700_s0 }
   0xe   :  { %v224_v40 = vld [vmem:[%s1229_s5] sm:$0xff]  ;;  %v225_v47 = vld [vmem:[%s1229_s5 + $0x8] sm:$0xff]  ;;  %v227_v49 = vld [vmem:[%s1229_s5 + $0x18] sm:$0xff]  ;;  %p1020_p0 = scmp.ne.s32.totalorder %s700_s0, %s1019_s7  ;;  %p1025_p2 = scmp.lt.s32.totalorder %s1019_s7, %s1019_s7 }
   0xf   :  { %927 = vmatpush3.bf16.msra.mxu1 %v924_v10  ;;  %v28_v50 = vld [vmem:[%s1227_s3 + $0x18] sm:$0x3]  ;;  %v27_v20 = vld [vmem:[%s1227_s3 + $0x10] sm:$0xff] }
  0x10   :  { %929 = vmatprep.subr.bf16.mxu1 %v928_v13  ;;  %p1026_p3 = por %p1025_p2, %p1024_p1 }
  0x12   :  { %p1027_p4 = pnand %p1026_p3, %p1020_p0 }
  0x13   :  { %931 = vmatpush3.bf16.msra.mxu1 %v928_v13 }
  0x14   :  { %933 = vmatprep.subr.bf16.mxu1 %v932_v16 }
  0x17   :  { %935 = vmatpush3.bf16.msra.mxu1 %v932_v16 }
  0x18   :  { %937 = vmatprep.subr.bf16.mxu1 %v936_v19 }
  0x1b   :  { %939 = vmatpush3.bf16.msra.mxu1 %v936_v19 }
  0x1c   :  { %941 = vmatprep.subr.bf16.mxu1 %v940_v22 }
  0x1f   :  { %943 = vmatpush3.bf16.msra.mxu1 %v940_v22 }
  0x20   :  { %945 = vmatprep.subr.bf16.mxu1 %v944_v29 }
  0x23   :  { %947 = vmatpush3.bf16.msra.mxu1 %v944_v29 }
  0x24   :  { %966 = vmatprep.subr.bf16.mxu1 %v916_v5 }
  0x74   :  { %v48_v23 = vpop.permute.xlu0 %47 }
  0x75   :  { %v912_v24 = vpack.c.bf16 %v24_v0, %v48_v23 }
  0x77   :  { %913 = vmatprep.subr.bf16.mxu0 %v912_v24 }
  0x78   :  { %915 = vmatpush3.bf16.msra.mxu0 %v912_v24  ;;  %v50_v25 = vpop.permute.xlu0 %49 }
  0x79   :  { %792 = vmatprep.subr.mxu0 %v50_v25 }
  0x7c   :  { %793 = vmatpush3.msra.mxu0 %v50_v25 }
  0x7d   :  { %795 = vmatmul.mubr.msk.f32.vlgmr.msra.gmra.mrb[0].mxu0 %vm53_vm0, %v52_v26 }
  0x7e   :  { %843 = vmatprep.mubr.msk.f32.mxu0 %vm228_vm1, %v224_v40 }
 0x150   :  { %v796_v32 = vpop.f32.mrb[0].mxu0 }
 0x151   :  { %v132_v33 = vadd.f32 %v796_v32, %v26_v30  ;;  %v126_v34 = vpop.f32.mrb[1].mxu0 }
 0x152   :  { %v127_v35 = vadd.f32 %v126_v34, %v25_v31 }
 0x153   :  { %v1157_v37 = vmax.f32 %v132_v33, 0.0  ;;  %v45_v33 = vld [vmem:[%s1228_s4 + $0x80] sm:$0xff] }
 0x154   :  { %v1155_v36 = vmax.f32 %v127_v35, 0.0 }
 0x155   :  { %v138_v39 = vmul.f32 %v1157_v37, %v1157_v37 }
 0x156   :  { %829 = vmatprep.mubr.f32.mxu1 %v1155_v36  ;;  %v137_v38 = vmul.f32 %v1155_v36, %v1155_v36 }
 0x157   :  { %830 = vmatmul.mubr.f32.vlgmr.msra.gmra.mrb[0].mxu1 %v1157_v37 }
 0x158   :  { %832 = vmatprep.mubr.f32.mxu1 %v137_v38  ;;  %968 = vmatpush3.bf16.msra.mxu1 %v916_v5 }
 0x159   :  { %970 = vmatprep.subr.bf16.mxu1 %v1104_v7 }
 0x15b   :  { %833 = vmatmul.mubr.f32.gmra.mrb[2].mxu1 %v138_v39 }
 0x15c   :  { %972 = vmatpush3.bf16.msra.mxu1 %v1104_v7 }
 0x15d   :  { %974 = vmatprep.subr.bf16.mxu1 %v924_v10 }
 0x160   :  { %976 = vmatpush3.bf16.msra.mxu1 %v924_v10  ;;  %v1047_v10 = vmov 0.0  }
 0x161   :  { %978 = vmatprep.subr.bf16.mxu1 %v928_v13 }
 0x164   :  { %980 = vmatpush3.bf16.msra.mxu1 %v928_v13 }
 0x165   :  { %982 = vmatprep.subr.bf16.mxu1 %v932_v16 }
 0x168   :  { %984 = vmatpush3.bf16.msra.mxu1 %v932_v16 }
 0x169   :  { %986 = vmatprep.subr.bf16.mxu1 %v936_v19 }
 0x16c   :  { %988 = vmatpush3.bf16.msra.mxu1 %v936_v19  ;;  %v448_v19 = vld [vmem:[%s1226_s2] sm:$0xff] }
 0x16d   :  { %990 = vmatprep.subr.bf16.mxu1 %v940_v22 }
 0x170   :  { %992 = vmatpush3.bf16.msra.mxu1 %v940_v22 }
 0x171   :  { %994 = vmatprep.subr.bf16.mxu1 %v944_v29 }
 0x174   :  { %996 = vmatpush3.bf16.msra.mxu1 %v944_v29 }
 0x22a   :  { %v831_v41 = vpop.f32.mrb[0].mxu1 }
 0x22b   :  { %v205_v42 = vpop.f32.mrb[1].mxu1 }
 0x22c   :  { %v948_v43 = vpack.c.bf16 %v831_v41, %v205_v42 }
 0x22e   :  { %v834_v44 = vpop.f32.mrb[2].mxu1  ;;  %949 = vmatprep.subr.bf16.mxu0 %v948_v43 }
 0x22f   :  { %v215_v45 = vpop.f32.mrb[3].mxu1  ;;  %951 = vmatpush3.bf16.msra.mxu0 %v948_v43 }
 0x230   :  { %v952_v46 = vpack.c.bf16 %v834_v44, %v215_v45 }
 0x232   :  { %953 = vmatprep.subr.bf16.mxu0 %v952_v46 }
 0x233   :  { %955 = vmatpush3.bf16.msra.mxu0 %v952_v46 }
 0x234   :  { %849 = vmatprep.subr.msk.mxu0 %vm347_vm2, %v28_v50 }
 0x236   :  { %844 = vmatmul.mubr.msk.f32.vlgmr.msra.gmra.mrb[2].mxu0 %vm228_vm1, %v225_v47 }
 0x237   :  { %846 = vmatprep.mubr.msk.f32.mxu0 %vm228_vm1, %v226_v48  ;;  %850 = vmatpush3.msk.msra.mxu0 %vm347_vm2, %v28_v50 }
 0x238   :  { %956 = vmatprep.subr.bf16.mxu0 %v1045_v1 }
 0x23a   :  { %847 = vmatmul.mubr.msk.f32.gmra.mrb[4].mxu0 %vm228_vm1, %v227_v49 }
 0x309   :  { %v845_v51 = vpop.f32.mrb[2].mxu0 }
 0x30a   :  { %v307_v52 = vpop.f32.mrb[3].mxu0  ;;  %v327_v53 = vmul.f32 %v845_v51, %v845_v51 }
 0x30b   :  { %851 = vmatprep.mubr.msk.f32.mxu0 %vm334_vm3, %v307_v52  ;;  %v326_v54 = vmul.f32 %v307_v52, %v307_v52 }
 0x30c   :  { %852 = vmatmul.mubr.msk.f32.vlgmr.msra.gmra.mrb[6].mxu0 %vm334_vm3, %v845_v51 }
 0x30d   :  { %v848_v55 = vpop.f32.mrb[4].mxu0 }
 0x30e   :  { %v329_v56 = vsub.f32 %v848_v55, %v327_v53  ;;  %v317_v57 = vpop.f32.mrb[5].mxu0 }
 0x30f   :  { %v328_v58 = vsub.f32 %v317_v57, %v326_v54 }
 0x310   :  { %v331_v59 = vadd.f32 1e-05, %v329_v56 }
 0x311   :  { %v330_v60 = vadd.f32 1e-05, %v328_v58 }
 0x313   :  { %1013 = vrsqrt.f32 %v330_v60 }
 0x314   :  { %1015 = vrsqrt.f32 %v331_v59 }
 0x31d   :  { %v1014_v61 = vpop.eup %1013 }
 0x31e   :  { %v1016_v62 = vpop.eup %1015  ;;  %854 = vmatprep.mubr.msk.f32.mxu0 %vm334_vm3, %v1014_v61 }
 0x31f   :  { %855 = vmatmul.mubr.msk.f32.gmra.mrb[8].mxu0 %vm334_vm3, %v1016_v62 }
 0x320   :  { %869 = vmatprep.mubr.msk.f32.mxu0 %vm1046_vm4, %v1047_v10 }
 0x3df   :  { %v853_v63 = vpop.f32.mrb[6].mxu0 }
 0x3e0   :  { %v417_v0 = vpop.f32.mrb[7].mxu0  ;;  %v437_v2 = vsub.f32 %v1157_v37, %v853_v63 }
 0x3e1   :  { %v436_v3 = vsub.f32 %v1155_v36, %v417_v0  ;;  %v46_v36 = vld [vmem:[%s1228_s4 + $0x88] sm:$0xff] }
 0x3f2   :  { %v856_v4 = vpop.f32.mrb[8].mxu0 }
 0x3f3   :  { %v439_v5 = vmul.f32 %v856_v4, %v437_v2  ;;  %v427_v6 = vpop.f32.mrb[9].mxu0 }
 0x3f4   :  { %v438_v7 = vmul.f32 %v436_v3, %v427_v6 }
 0x3f6   :  { %v960_v8 = vpack.c.bf16 %v439_v5, %v438_v7  ;;  %v1003_v9 = vpack.i.bf16 %v439_v5, %v438_v7 }
 0x3f8   :  { %1004 = vrot.lane.b32.xlu1 %v1003_v9, %s1043_s25 }
 0x3fc   :  { %1009 = vrot.lane.b32.xlu1 %v1003_v9, %s1044_s13 }
 0x46a   :  { %v1005_v11 = vpop.permute.xlu1 %1004 }
 0x46b   :  { %v1007_v12 = vunpack.i.h.bf16 %v1005_v11  ;;  %v1006_v13 = vunpack.i.l.bf16 %v1005_v11 }
 0x46d   :  { %v957_v14 = vpack.c.bf16 %v1007_v12, %v1006_v13 }
 0x46e   :  { %v1010_v15 = vpop.permute.xlu1 %1009 }
 0x46f   :  { %958 = vmatpush3.bf16.msra.mxu0 %v957_v14  ;;  %v1012_v16 = vunpack.i.h.bf16 %v1010_v15  ;;  %v1011_v17 = vunpack.i.l.bf16 %v1010_v15 }
 0x470   :  { %959 = vmatprep.subr.bf16.mxu0 %v1045_v1 }
 0x471   :  { %v963_v18 = vpack.c.bf16 %v1012_v16, %v1011_v17 }
 0x473   :  { %961 = vmatpush3.bf16.msra.mxu0 %v960_v8 }
 0x474   :  { %962 = vmatprep.subr.bf16.mxu0 %v1045_v1 }
 0x477   :  { %964 = vmatpush3.bf16.msra.mxu0 %v963_v18 }
 0x478   :  { %907 = vmatprep.subr.msk.mxu0 %vm347_vm2, %v28_v50 }
 0x47a   :  { %870 = vmatmul.mubr.msk.f32.vlgmr.msra.gmra.mrb[10].mxu0 %vm449_vm5, %v448_v19 }
 0x47b   :  { %908 = vmatpush3.msk.msra.mxu0 %vm347_vm2, %v28_v50 }
 0x54d   :  { %v519_v21 = vpop.f32.mrb[10].mxu0 }
 0x54e   :  { %v520_v22 = vadd.f32 %v519_v21, %v27_v20  ;;  %v871_v23 = vpop.f32.mrb[11].mxu0 }
 0x550   :  { %v523_v24 = vmax.f32 %v520_v22, 0.0 }
 0x552   :  { %v524_v25 = vmul.f32 %v523_v24, %v523_v24  ;;  %904 = vmatprep.mubr.f32.mxu1 %v523_v24 }
 0x554   :  { %905 = vmatmul.mubr.f32.vlgmr.msra.gmra.mrb[4].mxu1 %v524_v25 }
 0x627   :  { %v906_v26 = vpop.f32.mrb[4].mxu1 }
 0x628   :  { %v591_v27 = vpop.f32.mrb[5].mxu1  ;;  %v601_v29 = vmul.f32 0.0625, %v906_v26 }
 0x629   :  { %v600_v28 = vmul.f32 0.0625, %v591_v27 }
 0x62b   :  { %v602_v30 = vmul.f32 %v600_v28, %v600_v28 }
 0x62d   :  { %v603_v31 = vsub.f32 %v601_v29, %v602_v30 }
 0x62f   :  { %v604_v32 = vadd.f32 1e-05, %v603_v31 }
 0x631   :  { %1017 = vrsqrt.f32 %v604_v32 }
 0x63b   :  { %v1018_v34 = vpop.eup %1017 }
 0x63c   :  { %v606_v35 = vmul.f32 %v1018_v34, %v45_v33 }
 0x63e   :  { %v607_v37 = vmul.f32 %v606_v35, %v600_v28  ;;  %909 = vmatprep.mubr.msk.f32.mxu0 %vm334_vm3, %v606_v35 }
 0x640   :  { %v608_v38 = vsub.f32 %v46_v36, %v607_v37 }
 0x642   :  { %910 = vmatmul.mubr.msk.f32.vlgmr.msra.gmra.mrb[12].mxu0 %vm334_vm3, %v608_v38 }
 0x715   :  { %v911_v39 = vpop.f32.mrb[12].mxu0 }
 0x716   :  { %v681_v40 = vpop.f32.mrb[13].mxu0 }
 0x717   :  { %v690_v41 = vmul.f32 %v681_v40, %v523_v24 }
 0x719   :  { %v691_v42 = vadd.f32 %v911_v39, %v690_v41 }
 0x71b   :  { %692 = vst [vmem:[#allocation2] sm:$0xff] %v691_v42 }
 0x71c   :  { %1030 = shalt.err (!%p1027_p4)
}
 0x71d   :  { %s1031_s9 = scalar_lea.hbm %s1230_s6, 128 }
 0x71e   :  { %p1032_p5 = scmp.ne.s32.totalorder %s1230_s6, %s1031_s9  ;;  %p1035_p6 = scmp.lt.u32.totalorder %s1031_s9, %s1230_s6 }
 0x720   :  { %p1037_p7 = pnand %p1035_p6, %p1032_p5 }
 0x722   :  { %1040 = shalt.err (!%p1037_p7)
}
 0x723   :  { %702 = dma.vmem_to_hbm [thread:$0]  %s700_s0, 128, %s1230_s6, [#allocation3]  }
 0x724   :  { %1041 = dma.done.wait [#allocation3], 128  }
 0x725   :  { %1042 = vsyncadd [#allocation3], 4294967168 }
 0x726   :  { %706 = vsyncpa [#allocation3], 1 }

</bundles_post_ra>
